<compile_context>
chip_gen: v5e
topology: v5e:2x2
jax: 0.10.0
libtpu: 0.0.40
codegen_flags: <defaults>
</compile_context>

<pallas_src>
import jax
import jax.numpy as jnp
from jax.experimental import pallas as pl
from jax.experimental.pallas import tpu as pltpu


_DEFAULT_CHUNK_BYTES = 16 * 1024 * 1024  # per grid-step DMA chunk (HBM->HBM, no VMEM)


def identity(x: jax.Array) -> jax.Array:
    """nn.Identity.forward: return the input unchanged (no copy, no kernel)."""
    return x


def _make_dma_copy_kernel(chunk_rows: int, n_full: int, tail_rows: int):
    """Build a kernel that DMA-copies row-chunk `i` of a (rows, cols) HBM slab."""
    # Split each chunk into up to 2 concurrent sub-DMAs to keep engines busy.
    full_sub = 2 if (chunk_rows >= 2 and chunk_rows % 2 == 0) else 1
    tail_sub = 2 if (tail_rows >= 2 and tail_rows % 2 == 0) else 1

    def _copy_rows(x_hbm, o_hbm, sem, row_start, nrows, nsub):
        sub = nrows // nsub
        copies = []
        for s in range(nsub):                      # static unroll
            off = row_start + s * sub
            cp = pltpu.make_async_copy(
                x_hbm.at[pl.ds(off, sub), :],
                o_hbm.at[pl.ds(off, sub), :],
                sem.at[s])
            cp.start()
            copies.append(cp)
        for cp in copies:                          # all in flight, then drain
            cp.wait()

    def kernel(x_hbm, o_hbm, sem):
        i = pl.program_id(0)
        row_start = i * chunk_rows

        if tail_rows == 0:
            _copy_rows(x_hbm, o_hbm, sem, row_start, chunk_rows, full_sub)
        else:
            @pl.when(i < n_full)
            def _():
                _copy_rows(x_hbm, o_hbm, sem, row_start, chunk_rows, full_sub)

            @pl.when(i == n_full)
            def _():
                _copy_rows(x_hbm, o_hbm, sem, row_start, tail_rows, tail_sub)

    return kernel


def identity_copy(x: jax.Array, *, max_chunk_bytes: int = _DEFAULT_CHUNK_BYTES
                  ) -> jax.Array:
    """Identity with an explicitly materialized output: direct HBM->HBM DMA copy."""
    orig_shape = x.shape
    dtype = x.dtype
    n = x.size
    if n == 0:
        return x  # nothing to copy

    itemsize = jnp.dtype(dtype).itemsize

    # 2D slab view of the flat array.  Cols capped at 1024 (lane density is
    # irrelevant for pure DMA; the cap just gives the row-chunking enough
    # granularity).  Ragged sizes (n % 128 != 0) become a single-row slab —
    # safe here because the DMA never touches VMEM, so no OOM ceiling.
    if n % 128 == 0:
        cols = 128
        for cand in (256, 512, 1024):
            if n % cand == 0:
                cols = cand
        rows = n // cols
    else:
        cols, rows = n, 1

    row_bytes = cols * itemsize
    chunk_rows = max(1, min(rows, max_chunk_bytes // row_bytes))
    n_full = rows // chunk_rows
    tail_rows = rows - n_full * chunk_rows
    n_chunks = n_full + (1 if tail_rows else 0)
    if n_chunks < 2 and rows >= 2:
        # Keep >= 2 grid steps so both v7x TensorCores can drive DMAs.
        chunk_rows = pl.cdiv(rows, 2)
        n_full = rows // chunk_rows
        tail_rows = rows - n_full * chunk_rows
        n_chunks = n_full + (1 if tail_rows else 0)

    kernel = _make_dma_copy_kernel(chunk_rows, n_full, tail_rows)

    out2d = pl.pallas_call(
        kernel,
        out_shape=jax.ShapeDtypeStruct((rows, cols), dtype),
        grid_spec=pltpu.PrefetchScalarGridSpec(
            num_scalar_prefetch=0,
            grid=(n_chunks,),
            in_specs=[pl.BlockSpec(memory_space=pl.ANY)],
            out_specs=pl.BlockSpec(memory_space=pl.ANY),
            scratch_shapes=[pltpu.SemaphoreType.DMA((2,))],
        ),
        compiler_params=pltpu.CompilerParams(
            dimension_semantics=("parallel",)),
        cost_estimate=pl.CostEstimate(
            flops=0, transcendentals=0, bytes_accessed=2 * n * itemsize),
    )(x.reshape(rows, cols))
    return out2d.reshape(orig_shape)


if __name__ == "__main__":
    key = jax.random.PRNGKey(0)
    # Small NCHW-style input consistent with the module usage.
    x = jax.random.normal(key, (2, 4, 16, 16), dtype=jnp.float32)

    # Structural fast path (the module's actual semantics): no copy at all.
    y_fast = identity(x)
    assert y_fast is x

    # Pallas kernel path: materialized HBM->HBM DMA copy (2-step parallel grid).
    y = jax.block_until_ready(identity_copy(x))
    assert y.shape == x.shape and y.dtype == x.dtype
    assert bool(jnp.all(y == x))

    # Exercise the multi-chunk grid with a tail chunk and mixed sub-DMA splits.
    x2 = jax.random.normal(jax.random.PRNGKey(1), (32, 1024), dtype=jnp.float32)
    y2 = jax.block_until_ready(identity_copy(x2, max_chunk_bytes=3 * 4096))
    assert bool(jnp.all(y2 == x2))

    # Exercise the ragged (n % 128 != 0) single-DMA path.
    x3 = jax.random.normal(jax.random.PRNGKey(2), (3, 5, 7), dtype=jnp.float32)
    y3 = jax.block_until_ready(identity_copy(x3))
    assert bool(jnp.all(y3 == x3))

    print("KERNEL_OK")
</pallas_src>

<mosaic_0001>
module attributes {stable_mosaic.version = 11 : i64} {
  func.func @kernel(%arg0: i32, %arg1: memref<2x1024xf32, #tpu.memory_space<any>>, %arg2: memref<2x1024xf32, #tpu.memory_space<any>>, %arg3: memref<2x!tpu.dma_semaphore, #tpu.memory_space<semaphore_mem>>) attributes {dimension_semantics = [#tpu.dimension_semantics<parallel>], iteration_bounds = array<i64: 2>, scalar_prefetch = 0 : i64, scratch_operands = 1 : i64, tpu.core_type = #tpu.core_type<tc>, window_params = [{}, {}]} {
    %c1_i32 = arith.constant 1 : i32
    %0 = arith.muli %arg0, %c1_i32 : i32
    %c0_i32 = arith.constant 0 : i32
    %1 = arith.addi %0, %c0_i32 : i32
    %c0_i32_0 = arith.constant 0 : i32
    %c0_i32_1 = arith.constant 0 : i32
    %2 = tpu.memref_slice %arg1[%1, %c0_i32_1] : memref<2x1024xf32, #tpu.memory_space<any>> -> memref<1x1024xf32, #tpu.memory_space<any>>
    %c0_i32_2 = arith.constant 0 : i32
    %3 = tpu.memref_slice %arg2[%1, %c0_i32_2] : memref<2x1024xf32, #tpu.memory_space<any>> -> memref<1x1024xf32, #tpu.memory_space<any>>
    %4 = tpu.memref_slice %arg3[%c0_i32_0] : memref<2x!tpu.dma_semaphore, #tpu.memory_space<semaphore_mem>> -> memref<1x!tpu.dma_semaphore, #tpu.memory_space<semaphore_mem>>
    %5 = tpu.memref_squeeze %4 : memref<1x!tpu.dma_semaphore, #tpu.memory_space<semaphore_mem>> -> memref<!tpu.dma_semaphore, #tpu.memory_space<semaphore_mem>>
    tpu.enqueue_dma source(%2 : memref<1x1024xf32, #tpu.memory_space<any>>) target(%3 : memref<1x1024xf32, #tpu.memory_space<any>>) target_semaphore(%5 : memref<!tpu.dma_semaphore, #tpu.memory_space<semaphore_mem>>)
    %c0_i32_3 = arith.constant 0 : i32
    %c0_i32_4 = arith.constant 0 : i32
    %6 = tpu.memref_slice %arg1[%1, %c0_i32_4] : memref<2x1024xf32, #tpu.memory_space<any>> -> memref<1x1024xf32, #tpu.memory_space<any>>
    %c0_i32_5 = arith.constant 0 : i32
    %7 = tpu.memref_slice %arg2[%1, %c0_i32_5] : memref<2x1024xf32, #tpu.memory_space<any>> -> memref<1x1024xf32, #tpu.memory_space<any>>
    %8 = tpu.memref_slice %arg3[%c0_i32_3] : memref<2x!tpu.dma_semaphore, #tpu.memory_space<semaphore_mem>> -> memref<1x!tpu.dma_semaphore, #tpu.memory_space<semaphore_mem>>
    %9 = tpu.memref_squeeze %8 : memref<1x!tpu.dma_semaphore, #tpu.memory_space<semaphore_mem>> -> memref<!tpu.dma_semaphore, #tpu.memory_space<semaphore_mem>>
    tpu.wait_dma2 semaphore(%9 : memref<!tpu.dma_semaphore, #tpu.memory_space<semaphore_mem>>) src(%6 : memref<1x1024xf32, #tpu.memory_space<any>>) dst(%7 : memref<1x1024xf32, #tpu.memory_space<any>>)
    return
  }
}

</mosaic_0001>

<bundles_post_ra>
// kernel: tpu_custom_call.1
= control target key start
LH: loop header
LB: loop body
LE: loop exit
PB: predicated region body
PF: predicated region fallthrough
CT: control target
= control target key end

     0   :  { %s86_s6 = smov 0   ;;  %s111_s0 = inlined_call_operand.hbm [shape: f32[2,1024], index: 0, kind: input, shape index: {}]   ;;  %s112_s1 = inlined_call_operand.hbm [shape: f32[2,1024], index: 1, kind: output, shape index: {}]  }
   0x1 LB: > { %s13_s7 = sshrl.u32 %s88_s6, 1  ;;  %s14_s8 = sand.u32 1, %s88_s6   ;;  %s88_s6 = sphi %s86_s6, %s11_s6  }
   0x2   : > { %s64_s9 = sshll.u32 %s13_s7, 4  ;;  %s90_s11 = smov 32  }
   0x3   : > { %s16_s10 = sadd.s32 %s64_s9, %s14_s8  ;;  %30 = sst [smem:[#allocation4]] %s90_s11 }
   0x4   : > { %s17_s14 = scalar_lea.hbm %s111_s0, %s16_s10  ;;  %s18_s17 = scalar_lea.hbm %s112_s1, %s16_s10 }
   0x5   : > { %s23_s18 = sshll.u32 %s17_s14, 4  ;;  %s25_s19 = sshll.u32 %s18_s17, 4  ;;  %s24_s18 = int_to_ptr.hbm [resolvable:$true] %s23_s18  ;;  %s26_s19 = int_to_ptr.hbm [resolvable:$true] %s25_s19 }
   0x6   : > { %32 = sst [smem:[#allocation4 + $0x1]] %s90_s11  ;;  %s91_s20 = smov 1  }
   0x7   : > { %34 = sst [smem:[#allocation4 + $0x2]] %s91_s20  ;;  %s92_s21 = smov [#allocation2]  }
   0x8   : > { %s93_s22 = smov [#allocation3]   ;;  %s94_s23 = smov 0  }
   0x9   : > { %36 = dma.general %s24_s18, 128, %s26_s19, %s92_s21, %s93_s22, [#allocation4], %s94_s23, 0  }
   0xa   : > { %84 = dma.done.wait [#allocation2], 128 }
   0xb   : > { %85 = vsyncadd [#allocation2], 4294967168  ;;  %s11_s6 = sadd.s32 1, %s88_s6  }
   0xc   : > { %p8_p0 = scmp.ge.s32.totalorder %s11_s6, 2  }
   0xe   :  { %10 = sbr.rel (!%p8_p0) target bundleno = 1 (0x1), region = 24 }
  0x13   :  { %40 = vsyncmov [#allocation2] }
  0x16   :  { %s41_s24 = vpop.sfrf %40 }
  0x17   :  { %p65_p1 = scmp.ne.s32.totalorder %s41_s24, 0 }
  0x19   :  { %45 = shalt.err (%p65_p1)  }
  0x1a   :  { %47 = vsyncmov [#allocation2 + $0x1] }
  0x1d   :  { %s48_s25 = vpop.sfrf %47 }
  0x1e   :  { %p66_p2 = scmp.ne.s32.totalorder %s48_s25, 0 }
  0x20   :  { %52 = shalt.err (%p66_p2)  }

</bundles_post_ra>
